<compile_context>
chip_gen: v6e
topology: v6e:2x2x1
jax: 0.10.0
libtpu: 0.0.40
codegen_flags: <defaults>
</compile_context>

<pallas_src>
import functools

import jax
import jax.numpy as jnp
import numpy as np
from jax.experimental import pallas as pl
from jax.experimental.pallas import tpu as pltpu

_LANE = 128


def _focal_loss_kernel(*refs, ts, hw, num_class, gamma, smooth, use_alpha,
                       needs_mask):
    if use_alpha:
        alpha_ref, logit_ref, target_ref, out_ref = refs
    else:
        logit_ref, target_ref, out_ref = refs
        alpha_ref = None

    j = pl.program_id(1)  # spatial step (reduction axis, innermost)

    @pl.when(j == 0)
    def _init():
        out_ref[...] = jnp.zeros_like(out_ref)

    logit = logit_ref[0].astype(jnp.float32)     # (C, ts)  class on sublanes
    tgt = target_ref[0]                          # (1, ts)  int32

    # idx[idx == 225] = 0
    idx = jnp.where(tgt == 225, jnp.zeros_like(tgt), tgt)         # (1, ts)

    cls = jax.lax.broadcasted_iota(jnp.int32, (num_class, ts), 0)  # (C, ts)
    is_target = cls == idx                                         # (C, ts)

    one_hot = is_target.astype(jnp.float32)
    if smooth:
        # label smoothing: clamp(one_hot, smooth/(C-1), 1-smooth)
        one_hot = jnp.clip(one_hot, smooth / (num_class - 1), 1.0 - smooth)

    # pt = (one_hot * logit).sum(class axis) + smooth   (sublane reduce over C)
    pt = jnp.sum(one_hot * logit, axis=0, keepdims=True) + jnp.float32(smooth)
    logpt = jnp.log(pt)                                            # (1, ts)

    one_minus_pt = 1.0 - pt
    g = float(gamma)
    if g == 0.0:
        focal = jnp.ones_like(one_minus_pt)
    elif g == float(int(g)) and 1.0 <= g <= 4.0:
        # integer gamma: plain VPU multiplies, no exp/log on the EUP
        focal = one_minus_pt
        for _ in range(int(g) - 1):
            focal = focal * one_minus_pt
    else:
        # NOTE: like the torch original, non-integer gamma can NaN if pt>1
        # (smooth makes one_minus_pt marginally negative).
        focal = jnp.power(one_minus_pt, jnp.float32(g))

    loss = focal * (-logpt)                                        # (1, ts)

    if use_alpha:
        alpha_col = alpha_ref[...]                                 # (C, 1)
        alpha_row = jnp.sum(jnp.where(is_target, alpha_col, jnp.float32(0.0)),
                            axis=0, keepdims=True)                 # (1, ts)
        loss = loss * alpha_row

    if needs_mask:
        # only compiled in when hw % ts != 0 (partial last spatial tile)
        col = j * ts + jax.lax.broadcasted_iota(jnp.int32, (1, ts), 1)
        loss = jnp.where(col < hw, loss, 0.0)

    # lane-wide resident accumulator for this batch element
    out_ref[...] += loss[None]                                     # (1, 1, ts)


def focal_loss_pallas(logit, target, *, alpha=None, gamma=1.0, balance_index=0,
                      smooth=1e-5, size_average=True, apply_nonlin=None,
                      block_spatial=None):
    """JAX/Pallas equivalent of FocalLoss.forward (apply_nonlin applied host-side)."""
    if smooth is not None and (smooth < 0 or smooth > 1.0):
        raise ValueError('smooth value should be in [0,1]')
    smooth_f = float(smooth) if smooth is not None else 0.0

    if apply_nonlin is not None:
        logit = apply_nonlin(logit)
    if logit.dtype != jnp.float32 and logit.dtype != jnp.bfloat16:
        logit = logit.astype(jnp.float32)  # bf16 stays bf16 (half the HBM read)

    num_class = logit.shape[1]

    # ---- layout: pure views (the torch view->permute->view is folded into the
    #      kernel's class-on-sublanes / spatial-on-lanes tiling) ----
    if logit.ndim > 2:
        n_batch = logit.shape[0]
        logit3d = logit.reshape(n_batch, num_class, -1)       # (N, C, HW), no copy
    else:
        # 2D (M, C) classification input: one small transpose to (1, C, M).
        n_batch = 1
        logit3d = jnp.transpose(logit.reshape(-1, num_class), (1, 0))[None]
    hw = logit3d.shape[2]

    tgt3d = target.reshape(n_batch, 1, hw).astype(jnp.int32)  # (N, 1, HW)

    # ---- alpha preprocessing (same rules as the torch module) ----
    if alpha is None:
        use_alpha = False
        alpha_arr = None
    else:
        use_alpha = True
        if isinstance(alpha, (list, tuple, np.ndarray)):
            a = np.asarray(alpha, dtype=np.float32).reshape(num_class)
            a = a / a.sum()
            alpha_vec = 1.0 / a
        elif isinstance(alpha, float):
            alpha_vec = np.full((num_class,), 1.0 - alpha, dtype=np.float32)
            alpha_vec[balance_index] = alpha
        else:
            raise TypeError('Not support alpha type')
        alpha_arr = jnp.asarray(alpha_vec, dtype=jnp.float32).reshape(num_class, 1)

    # ---- spatial tile selection (lane-dense, VMEM-budgeted for v7x 64 MiB) ----
    itemsize = logit3d.dtype.itemsize
    # double-buffered logit + target tiles plus the resident f32 accumulator,
    # per lane column of the spatial tile.
    per_col_bytes = 2 * num_class * itemsize + 2 * 4 + 2 * 4
    vmem_data_budget = 24 * 1024 * 1024
    ts_cap = max(_LANE, (vmem_data_budget // per_col_bytes) // _LANE * _LANE)
    ts_pref = 16384 if block_spatial is None else int(block_spatial)
    ts_pref = max(_LANE, (min(ts_pref, ts_cap) // _LANE) * _LANE)
    if hw <= ts_pref:
        ts = hw                      # single spatial step; full-extent block
        num_j = 1
        needs_mask = False
    else:
        ts = ts_pref                 # multiple of 128
        num_j = (hw + ts - 1) // ts
        needs_mask = (hw % ts) != 0

    kernel = functools.partial(
        _focal_loss_kernel, ts=ts, hw=hw, num_class=num_class,
        gamma=float(gamma), smooth=smooth_f, use_alpha=use_alpha,
        needs_mask=needs_mask)

    in_specs = [
        pl.BlockSpec((1, num_class, ts), lambda n, j: (n, 0, j)),  # logits tile
        pl.BlockSpec((1, 1, ts), lambda n, j: (n, 0, j)),          # targets tile
    ]
    args = [logit3d, tgt3d]
    if use_alpha:
        in_specs = [pl.BlockSpec((num_class, 1), lambda n, j: (0, 0))] + in_specs
        args = [alpha_arr] + args

    partial_out = pl.pallas_call(
        kernel,
        out_shape=jax.ShapeDtypeStruct((n_batch, 1, ts), jnp.float32),
        grid_spec=pltpu.PrefetchScalarGridSpec(
            num_scalar_prefetch=0,
            grid=(n_batch, num_j),
            in_specs=in_specs,
            out_specs=pl.BlockSpec((1, 1, ts), lambda n, j: (n, 0, 0)),
        ),
        compiler_params=pltpu.CompilerParams(
            dimension_semantics=("parallel", "arbitrary"),
            vmem_limit_bytes=48 * 1024 * 1024),
    )(*args)

    # tiny (N, 1, ts) partial-sum reduce + mean done host-side in XLA
    total = jnp.sum(partial_out)
    if size_average:
        return total / jnp.float32(n_batch * hw)
    return total


def _focal_loss_ref(logit, target, *, alpha=None, gamma=1.0, balance_index=0,
                    smooth=1e-5, size_average=True):
    """Pure-JAX reference mirroring the torch forward."""
    num_class = logit.shape[1]
    n = logit.shape[0]
    if logit.ndim > 2:
        l2 = jnp.transpose(logit.reshape(n, num_class, -1),
                           (0, 2, 1)).reshape(-1, num_class)
    else:
        l2 = logit.reshape(-1, num_class)
    l2 = l2.astype(jnp.float32)
    t = target.reshape(-1, 1).astype(jnp.int32)

    if alpha is None:
        alpha_vec = np.ones((num_class,), dtype=np.float32)
    elif isinstance(alpha, (list, tuple, np.ndarray)):
        a = np.asarray(alpha, dtype=np.float32).reshape(num_class)
        a = a / a.sum()
        alpha_vec = 1.0 / a
    elif isinstance(alpha, float):
        alpha_vec = np.full((num_class,), 1.0 - alpha, dtype=np.float32)
        alpha_vec[balance_index] = alpha
    else:
        raise TypeError('Not support alpha type')

    idx = jnp.where(t == 225, 0, t)
    one_hot = (jnp.arange(num_class)[None, :] == idx).astype(jnp.float32)
    if smooth:
        one_hot = jnp.clip(one_hot, smooth / (num_class - 1), 1.0 - smooth)
    pt = jnp.sum(one_hot * l2, axis=1) + smooth
    logpt = jnp.log(pt)
    alpha_r = jnp.asarray(alpha_vec)[jnp.squeeze(idx, 1)]
    loss = -1.0 * alpha_r * (1.0 - pt) ** gamma * logpt
    return jnp.mean(loss) if size_average else jnp.sum(loss)


if __name__ == "__main__":
    key = jax.random.PRNGKey(0)
    k1, k2, k3, k4 = jax.random.split(key, 4)

    # --- test 1: module defaults (alpha=None, gamma=1), NCHW input ---
    N, C, H, W = 2, 4, 16, 16
    raw = jax.random.normal(k1, (N, C, H, W), dtype=jnp.float32)
    # defaults have apply_nonlin=None (no softmax inside the module); feed
    # probability-like inputs so log(pt) is well defined, as the module assumes.
    logits = jax.nn.softmax(raw, axis=1)
    target = jax.random.randint(k2, (N, 1, H, W), 0, C, dtype=jnp.int32)

    loss = focal_loss_pallas(logits, target, alpha=None, gamma=1.0,
                             smooth=1e-5, size_average=True)
    loss = jax.block_until_ready(loss)
    ref = _focal_loss_ref(logits, target, alpha=None, gamma=1.0, smooth=1e-5)
    assert jnp.allclose(loss, ref, rtol=5e-5, atol=1e-5), (loss, ref)

    # --- test 2: alpha list + gamma=2 + multi-step spatial grid w/ partial tile ---
    H2, W2 = 20, 20
    raw2 = jax.random.normal(k3, (N, C, H2, W2), dtype=jnp.float32)
    logits2 = jax.nn.softmax(raw2, axis=1)
    target2 = jax.random.randint(k4, (N, 1, H2, W2), 0, C, dtype=jnp.int32)
    alpha_list = [0.2, 0.3, 0.1, 0.4]
    loss2 = focal_loss_pallas(logits2, target2, alpha=alpha_list, gamma=2.0,
                              smooth=1e-5, size_average=True, block_spatial=128)
    loss2 = jax.block_until_ready(loss2)
    ref2 = _focal_loss_ref(logits2, target2, alpha=alpha_list, gamma=2.0,
                           smooth=1e-5)
    assert jnp.allclose(loss2, ref2, rtol=5e-5, atol=1e-5), (loss2, ref2)

    print("KERNEL_OK")
</pallas_src>

<mosaic_0001>
module attributes {stable_mosaic.version = 11 : i64} {
  func.func @_focal_loss_kernel(%arg0: i32, %arg1: i32, %arg2: memref<1x4x256xf32, #tpu.memory_space<vmem>>, %arg3: memref<1x1x256xi32, #tpu.memory_space<vmem>>, %arg4: memref<1x1x256xf32, #tpu.memory_space<vmem>>) attributes {dimension_semantics = [#tpu.dimension_semantics<parallel>, #tpu.dimension_semantics<arbitrary>], iteration_bounds = array<i64: 2, 1>, scalar_prefetch = 0 : i64, scratch_operands = 0 : i64, tpu.core_type = #tpu.core_type<tc>, window_params = [{transform_indices = @transform_0, window_bounds = array<i64: 1, 4, 256>}, {transform_indices = @transform_1, window_bounds = array<i64: 1, 1, 256>}, {transform_indices = @transform_2, window_bounds = array<i64: 1, 1, 256>}]} {
    %c0_i32 = arith.constant 0 : i32
    %0 = arith.cmpi eq, %arg1, %c0_i32 : i32
    %1 = arith.extui %0 : i1 to i32
    %c0_i32_0 = arith.constant 0 : i32
    %2 = arith.cmpi ne, %1, %c0_i32_0 : i32
    scf.if %2 {
      %cst_18 = arith.constant 0.000000e+00 : f32
      %35 = vector.broadcast %cst_18 : f32 to vector<1x1x256xf32>
      %c0_19 = arith.constant 0 : index
      %c0_20 = arith.constant 0 : index
      %c0_21 = arith.constant 0 : index
      %36 = vector.load %arg4[%c0_19, %c0_20, %c0_21] : memref<1x1x256xf32, #tpu.memory_space<vmem>>, vector<1x1x256xf32>
      tpu.vector_store %arg4[%c0_19, %c0_20, %c0_21], %35 {strides = array<i32>} : memref<1x1x256xf32, #tpu.memory_space<vmem>>, vector<1x1x256xf32>,
    } else {
    }
    %c0 = arith.constant 0 : index
    %c0_1 = arith.constant 0 : index
    %c0_2 = arith.constant 0 : index
    %3 = vector.load %arg2[%c0, %c0_1, %c0_2] : memref<1x4x256xf32, #tpu.memory_space<vmem>>, vector<1x4x256xf32>
    %4 = vector.shape_cast %3 : vector<1x4x256xf32> to vector<4x256xf32>
    %c0_3 = arith.constant 0 : index
    %c0_4 = arith.constant 0 : index
    %c0_5 = arith.constant 0 : index
    %5 = vector.load %arg3[%c0_3, %c0_4, %c0_5] : memref<1x1x256xi32, #tpu.memory_space<vmem>>, vector<1x1x256xi32>
    %6 = vector.shape_cast %5 : vector<1x1x256xi32> to vector<1x256xi32>
    %c225_i32 = arith.constant 225 : i32
    %7 = vector.broadcast %c225_i32 : i32 to vector<1x256xi32>
    %8 = arith.cmpi eq, %6, %7 : vector<1x256xi32>
    %c0_i32_6 = arith.constant 0 : i32
    %9 = vector.broadcast %c0_i32_6 : i32 to vector<1x256xi32>
    %10 = arith.select %8, %9, %6 : vector<1x256xi1>, vector<1x256xi32>
    %11 = tpu.iota {dimensions = array<i32: 0>} : vector<4x256xi32>
    %12 = vector.broadcast %10 : vector<1x256xi32> to vector<4x256xi32>
    %13 = arith.cmpi eq, %11, %12 : vector<4x256xi32>
    %14 = arith.extui %13 : vector<4x256xi1> to vector<4x256xi32>
    %15 = arith.sitofp %14 : vector<4x256xi32> to vector<4x256xf32>
    %cst = arith.constant 3.33333332E-6 : f32
    %cst_7 = arith.constant 0.999989986 : f32
    %16 = vector.broadcast %cst : f32 to vector<4x256xf32>
    %17 = arith.maximumf %16, %15 : vector<4x256xf32>
    %18 = vector.broadcast %cst_7 : f32 to vector<4x256xf32>
    %19 = arith.minimumf %18, %17 : vector<4x256xf32>
    %20 = arith.mulf %19, %4 : vector<4x256xf32>
    %cst_8 = arith.constant dense<0.000000e+00> : vector<256xf32>
    %21 = vector.multi_reduction <add>, %20, %cst_8 [0] : vector<4x256xf32> to vector<256xf32>
    %22 = vector.shape_cast %21 : vector<256xf32> to vector<1x256xf32>
    %cst_9 = arith.constant 9.99999974E-6 : f32
    %23 = vector.broadcast %cst_9 : f32 to vector<1x256xf32>
    %24 = arith.addf %22, %23 : vector<1x256xf32>
    %25 = math.log %24 : vector<1x256xf32>
    %cst_10 = arith.constant 1.000000e+00 : f32
    %26 = vector.broadcast %cst_10 : f32 to vector<1x256xf32>
    %27 = arith.subf %26, %24 : vector<1x256xf32>
    %cst_11 = arith.constant 0.000000e+00 : f32
    %28 = vector.broadcast %cst_11 : f32 to vector<1x256xf32>
    %29 = arith.subf %28, %25 : vector<1x256xf32>
    %30 = arith.mulf %27, %29 : vector<1x256xf32>
    %c0_12 = arith.constant 0 : index
    %c0_13 = arith.constant 0 : index
    %c0_14 = arith.constant 0 : index
    %31 = vector.load %arg4[%c0_12, %c0_13, %c0_14] : memref<1x1x256xf32, #tpu.memory_space<vmem>>, vector<1x1x256xf32>
    %32 = vector.shape_cast %30 : vector<1x256xf32> to vector<1x1x256xf32>
    %33 = arith.addf %31, %32 : vector<1x1x256xf32>
    %c0_15 = arith.constant 0 : index
    %c0_16 = arith.constant 0 : index
    %c0_17 = arith.constant 0 : index
    %34 = vector.load %arg4[%c0_15, %c0_16, %c0_17] : memref<1x1x256xf32, #tpu.memory_space<vmem>>, vector<1x1x256xf32>
    tpu.vector_store %arg4[%c0_15, %c0_16, %c0_17], %33 {strides = array<i32>} : memref<1x1x256xf32, #tpu.memory_space<vmem>>, vector<1x1x256xf32>,
    return
  }
  func.func @transform_0(%arg0: i32, %arg1: i32) -> (i32, i32, i32) {
    %c0_i32 = arith.constant 0 : i32
    %c0_i32_0 = arith.constant 0 : i32
    return %arg0, %c0_i32, %arg1 : i32, i32, i32
  }
  func.func @transform_1(%arg0: i32, %arg1: i32) -> (i32, i32, i32) {
    %c0_i32 = arith.constant 0 : i32
    %c0_i32_0 = arith.constant 0 : i32
    return %arg0, %c0_i32, %arg1 : i32, i32, i32
  }
  func.func @transform_2(%arg0: i32, %arg1: i32) -> (i32, i32, i32) {
    %c0_i32 = arith.constant 0 : i32
    %c0_i32_0 = arith.constant 0 : i32
    %c0_i32_1 = arith.constant 0 : i32
    return %arg0, %c0_i32, %c0_i32_0 : i32, i32, i32
  }
}

</mosaic_0001>

<bundles_post_ra>
// kernel: tpu_custom_call.1
= control target key start
LH: loop header
LB: loop body
LE: loop exit
PB: predicated region body
PF: predicated region fallthrough
CT: control target
= control target key end

     0   :  { %7 = vsyncpa [#allocation3], 0  ;;  %s870_s0 = inlined_call_operand.hbm [shape: f32[2,4,256], index: 0, kind: input, shape index: {}]   ;;  %s871_s1 = inlined_call_operand.hbm [shape: s32[2,1,256], index: 1, kind: input, shape index: {}]   ;;  %s872_s2 = inlined_call_operand.hbm [shape: f32[2,1,256], index: 2, kind: output, shape index: {}]  }
   0x1   :  { %9 = vsyncpa [#allocation3 + $0x1], 0 }
   0x2   :  { %10 = vsyncpa [#allocation6], 0 }
   0x3   :  { %12 = vsyncpa [#allocation6 + $0x1], 0 }
   0x4   :  { %13 = vsyncpa [#allocation4], 0 }
   0x5   :  { %15 = vsyncpa [#allocation4 + $0x1], 0  ;;  %s692_s9 = smov 0   ;;  %s694_s10 = smov 0  }
   0x6   :  { %s696_s11 = smov 0   ;;  %s698_s12 = smov 0  }
   0x7   :  { %s700_s13 = smov 0   ;;  %s702_s14 = smov 0  }
   0x8 LB: > { %s432_s15 = sadd.s32 4294967295, %s670_s14   ;;  %s433_s16 = sadd.s32 4294967294, %s670_s14   ;;  %s670_s14 = sphi %s702_s14, %s21_s14   ;;  %s666_s13 = sphi %s700_s13, %s886_s13   ;;  %s662_s12 = sphi %s698_s12, %s885_s12   ;;  %s658_s11 = sphi %s696_s11, %s884_s11   ;;  %s654_s10 = sphi %s694_s10, %s883_s10   ;;  %s650_s9 = sphi %s692_s9, %s882_s9  }
   0x9   : > { %s33_s17 = sadd.s32 1, %s666_s13  ;;  %s42_s18 = sadd.s32 1, %s658_s11 }
   0xa   : > { %p35_p0 = scmp.ge.s32.totalorder %s33_s17, 2  ;;  %p49_p1 = scmp.ne.s32.totalorder %s658_s11, %s654_s10 }
   0xb   : > { %p50_p2 = scmp.eq.s32.totalorder %s670_s14, 0  ;;  %p55_p3 = scmp.ne.s32.totalorder %s654_s10, %s650_s9 }
   0xc   : > { %s888_s17 = smov (%p35_p0, %s33_s17), 0  ;;  %p56_p5 = scmp.eq.s32.totalorder %s432_s15, 0 }
   0xd   : > { %p733_p4 = por %p50_p2, %p49_p1  ;;  %s37_s20 = ssub.s32 %s666_s13, %s888_s17 }
   0xe   : > { %p107_p6 = scmp.eq.s32.totalorder %s432_s15, 1  ;;  %p40_p7 = scmp.eq.s32.totalorder %s37_s20, 0 }
   0xf   : > { %p739_p8 = por %p56_p5, %p55_p3  ;;  %p113_p10 = scmp.eq.s32.totalorder %s433_s16, 1 }
  0x10   : > { %p743_p9 = por %p107_p6, %p49_p1  ;;  %p473_p13 = scmp.lt.s32.totalorder %s670_s14, 2 }
  0x11   : > { %s748_s23 = scalar_select %p40_p7, %s658_s11, %s42_s18  }
  0x12   : > { %p750_p11 = por %p113_p10, %p55_p3  ;;  %s757_s25 = sand.u32 1, %s658_s11  }
  0x13   : > { %s436_s26 = sshll.u32 %s757_s25, 3  ;;  %s453_s27 = sshll.u32 %s666_s13, 7 }
  0x14   : > { %s145_s30 = scalar_lea.hbm %s870_s0, %s453_s27  ;;  %s137_s3 = scalar_lea.vmem [#allocation2], %s436_s26 }
  0x15   : > { %s147_s4 = sshll.u32 %s137_s3, 4  ;;  %p766_p0 = pnand %p473_p13, %p733_p4  ;;  %s148_s4 = int_to_ptr.vmem [resolvable:$true] %s147_s4 }
  0x16   : > { %p442_p1 = scmp.ge.s32.totalorder %s670_s14, 1  ;;  %p173_p2 = scmp.lt.s32.totalorder %s670_s14, 3 }
  0x17   : > { %s134_s6 = scalar_lea.sflag [#allocation3], %s757_s25  ;;  %p532_p3 = pneg %p766_p0 }
  0x18   : > { %s543_s7 = scalar_lea.vmem %s148_s4, 128  ;;  %s672_s8 = smov [#allocation2]  }
  0x19   : > { %p544_p5 = scmp.ne.s32.totalorder %s148_s4, %s543_s7  ;;  %s548_s15 = sshll.u32 %s672_s8, 4  ;;  %s549_s15 = int_to_ptr.vmem [resolvable:$false] %s548_s15 }
  0x1a   : > { %s550_s16 = scalar_lea.vmem %s549_s15, 256  ;;  %p551_p4 = scmp.lt.s32.totalorder %s148_s4, %s549_s15 }
  0x1b   : > { %p546_p6 = pnand %p544_p5, %p532_p3  ;;  %p552_p10 = scmp.lt.s32.totalorder %s550_s16, %s543_s7 }
  0x1d   : > { %p547_p7 = pneg %p546_p6  ;;  %p553_p13 = por %p552_p10, %p551_p4 }
  0x1f   : > { %p554_p12 = pnand %p553_p13, %p547_p7 }
  0x21   : > { %557 = shalt.err (!%p554_p12)
}
  0x22   : > { %465 = dma.hbm_to_vmem [thread:$0]  (!%p766_p0), %s145_s30, 128, %s148_s4, %s134_s6  }
  0x23   : > { %p784_p5 = pnand %p442_p1, %p173_p2  ;;  %s439_s19 = sshll.u32 %s757_s25, 1 }
  0x24   : > { %s454_s20 = sshll.u32 %s666_s13, 5  ;;  %s158_s29 = scalar_lea.vmem [#allocation5], %s439_s19 }
  0x25   : > { %s166_s28 = scalar_lea.hbm %s871_s1, %s454_s20  ;;  %s168_s3 = sshll.u32 %s158_s29, 4  ;;  %s169_s3 = int_to_ptr.vmem [resolvable:$true] %s168_s3 }
  0x26   : > { %s155_s7 = scalar_lea.sflag [#allocation6], %s757_s25  ;;  %s571_s8 = scalar_lea.vmem %s169_s3, 32 }
  0x27   : > { %p572_p12 = scmp.ne.s32.totalorder %s169_s3, %s571_s8  ;;  %s673_s30 = smov [#allocation5]  }
  0x28   : > { %s576_s4 = sshll.u32 %s673_s30, 4  ;;  %s577_s4 = int_to_ptr.vmem [resolvable:$false] %s576_s4 }
  0x29   : > { %p574_p6 = pnand %p572_p12, %p532_p3  ;;  %s578_s6 = scalar_lea.vmem %s577_s4, 64 }
  0x2a   : > { %p579_p1 = scmp.lt.s32.totalorder %s169_s3, %s577_s4  ;;  %p580_p2 = scmp.lt.s32.totalorder %s578_s6, %s571_s8 }
  0x2b   : > { %p575_p7 = pneg %p574_p6 }
  0x2c   : > { %p581_p4 = por %p580_p2, %p579_p1 }
  0x2e   : > { %p582_p10 = pnand %p581_p4, %p575_p7 }
  0x30   : > { %585 = shalt.err (!%p582_p10)
}
  0x31   : > { %468 = dma.hbm_to_vmem [thread:$0]  (!%p766_p0), %s166_s28, 32, %s169_s3, %s155_s7  }
  0x32   : > { %177 = sbr.rel (%p784_p5) target bundleno = 132 (0x84), region = 28  ;;  %s802_s25 = sand.u32 (!%p784_p5), 1, %s654_s10  }
  0x33   : > { %s443_s15 = sshll.u32 (!%p784_p5), %s802_s25, 3  ;;  %s180_s16 = scalar_lea.sflag (!%p784_p5), [#allocation3], %s802_s25 }
  0x34   : > { %s183_s19 = scalar_lea.vmem (!%p784_p5), [#allocation2], %s443_s15 }
  0x37   : > { %637 = dma.done.wait (%p739_p8), %s180_s16, 128  }
  0x38   : > { %639 = vsyncadd (%p739_p8), %s180_s16, 4294967168  ;;  %s444_s5 = sshll.u32 %s802_s25, 1  ;;  %s189_s18 = scalar_lea.sflag [#allocation6], %s802_s25 }
  0x39   : > { %s192_s20 = scalar_lea.vmem [#allocation5], %s444_s5 }
  0x3a   : > { %641 = dma.done.wait (%p739_p8), %s189_s18, 32  }
  0x3b   : > { %643 = vsyncadd (%p739_p8), %s189_s18, 4294967264  ;;  %v224_v0 = vlaneseq  ;;  %s820_s26 = scalar_lea.vmem [#allocation7], %s444_s5  ;;  %v674_v3 = vmov 0.0   ;;  %v230_v6 = vld [vmem:[%s192_s20] sm:$0x3]  ;;  %v229_v10 = vld [vmem:[%s183_s19] sm:$0xff] }
  0x3c   : > { %vm231_vm1 = vcmp.eq.s32.totalorder %v230_v6, 225  ;;  %v254_v15 = vcombine.high %v229_v10, %v229_v10  ;;  %vm258_vm4 = vcmask 1043456   ;;  %v675_v36 = vmov 1966171168   ;;  %s455_s21 = sshll.u32 %s662_s12, 5  ;;  %s325_s27 = sshll.u32 %s820_s26, 4  ;;  %s326_s27 = int_to_ptr.vmem [resolvable:$true] %s325_s27 }
  0x3d   : > { %vm816_vm0 = vcmp.lt.s32.totalorder %v224_v0, 256  ;;  %v234_v2 = vshrl.u32 %v224_v0, 7  ;;  %v232_v7 = vsel %vm231_vm1, 0, %v230_v6  ;;  %v290_v37 = vunpack.c.l.s4 %v675_v36  ;;  %s323_s3 = scalar_lea.hbm %s872_s2, %s455_s21  ;;  %s311_s7 = scalar_lea.sflag [#allocation4], %s802_s25 }
  0x3e   : > { %228 = vst.msk [vmem:[%s820_s26] sm:$0x3] %vm816_vm0, %v674_v3  ;;  %s586_s8 = scalar_lea.vmem %s326_s27, 32  ;;  %s676_s30 = smov [#allocation7]  }
  0x3f   : > { %v237_v4 = vsub.s32 0, %v234_v2  ;;  %v241_v5 = vsub.s32 1, %v234_v2  ;;  %v291_v44 = vunpack.c.0.s8 %v290_v37  ;;  %p587_p8 = scmp.ne.s32.totalorder %s326_s27, %s586_s8  ;;  %s590_s4 = sshll.u32 %s676_s30, 4  ;;  %s591_s4 = int_to_ptr.vmem [resolvable:$false] %s590_s4 }
  0x40   : > { %s592_s12 = scalar_lea.vmem %s591_s4, 64  ;;  %p593_p13 = scmp.lt.s32.totalorder %s326_s27, %s591_s4 }
  0x41   : > { %v238_v8 = vrot.slane %v232_v7, %v237_v4  ;;  %v242_v9 = vrot.slane %v232_v7, %v241_v5  ;;  %v294_v49 = vsub.s32 %v291_v44, %v234_v2  ;;  %p588_p0 = pnand %p587_p8, %p743_p9  ;;  %p594_p5 = scmp.lt.s32.totalorder %s592_s12, %s586_s8 }
  0x43   : > { %vm243_vm2 = vcmp.eq.s32.totalorder %v234_v2, %v238_v8  ;;  %vm244_vm3 = vcmp.eq.s32.totalorder %v234_v2, %v242_v9  ;;  %p589_p3 = pneg %p588_p0  ;;  %p595_p12 = por %p594_p5, %p593_p13 }
  0x44   : > { %v446_v11 = vsel %vm243_vm2, 1.0, %v674_v3  ;;  %v447_v12 = vsel %vm244_vm3, 1.0, %v674_v3 }
  0x45   : > { %v249_v13 = vmax.f32 %v446_v11, 3.3333333e-06  ;;  %v250_v14 = vmax.f32 %v447_v12, 3.3333333e-06  ;;  %v285_v52 = vld [vmem:[%s820_s26] sm:$0x3]  ;;  %p596_p6 = pnand %p595_p12, %p589_p3 }
  0x47   : > { %v251_v16 = vmin.f32 %v249_v13, 0.99999  ;;  %v252_v17 = vmin.f32 %v250_v14, 0.99999 }
  0x49   : > { %v256_v18 = vmul.f32 %v251_v16, %v229_v10  ;;  %v257_v19 = vmul.f32 %v254_v15, %v252_v17 }
  0x4b   : > { %v259_v20 = vsel %vm258_vm4, %v256_v18, 0.0  ;;  %v266_v21 = vsel %vm258_vm4, %v257_v19, 0.0 }
  0x4c   : > { %v260_v22 = vrot.slane %v259_v20, 4  ;;  %v267_v23 = vrot.slane %v266_v21, 4 }
  0x4e   : > { %v261_v24 = vadd.f32 %v260_v22, %v259_v20  ;;  %v268_v25 = vadd.f32 %v267_v23, %v266_v21 }
  0x50   : > { %v262_v26 = vrot.slane %v261_v24, 2  ;;  %v269_v27 = vrot.slane %v268_v25, 2 }
  0x52   : > { %v263_v28 = vadd.f32 %v262_v26, %v261_v24  ;;  %v270_v29 = vadd.f32 %v269_v27, %v268_v25 }
  0x54   : > { %v264_v30 = vrot.slane %v263_v28, 1  ;;  %v271_v31 = vrot.slane %v270_v29, 1 }
  0x56   : > { %v265_v32 = vadd.f32 %v264_v30, %v263_v28  ;;  %v272_v33 = vadd.f32 %v271_v31, %v270_v29 }
  0x58   : > { %v273_v34 = vadd.f32 1e-05, %v265_v32  ;;  %v274_v35 = vadd.f32 1e-05, %v272_v33 }
  0x5a   : > { %526 = vlog2.f32 %v273_v34  ;;  %v279_v41 = vsub.f32 1.0, %v273_v34  ;;  %v280_v43 = vsub.f32 1.0, %v274_v35 }
  0x5b   : > { %528 = vlog2.f32 %v274_v35 }
  0x67   : > { %v527_v38 = vpop.eup %526 }
  0x68   : > { %v529_v39 = vpop.eup %528  ;;  %v276_v40 = vmul.f32 0.6931472, %v527_v38 }
  0x69   : > { %v278_v42 = vmul.f32 0.6931472, %v529_v39 }
  0x6a   : > { %v281_v45 = vsub.f32 0.0, %v276_v40 }
  0x6b   : > { %v282_v46 = vsub.f32 0.0, %v278_v42 }
  0x6c   : > { %v283_v47 = vmul.f32 %v281_v45, %v279_v41 }
  0x6d   : > { %v284_v48 = vmul.f32 %v282_v46, %v280_v43 }
  0x6f   : > { %v288_v50 = vcombine.low %v283_v47, %v284_v48 }
  0x71   : > { %v295_v51 = vrot.slane %v288_v50, %v294_v49 }
  0x73   : > { %v302_v53 = vrot.slane %v295_v51, %v294_v49 }
  0x75   : > { %v304_v54 = vadd.f32 %v302_v53, %v285_v52 }
  0x77   : > { %309 = vst.msk [vmem:[%s820_s26] sm:$0x3] %vm816_vm0, %v304_v54 }
  0x78   : > { %599 = shalt.err (!%p596_p6)
}
  0x79   : > { %s600_s6 = scalar_lea.hbm %s323_s3, 32  ;;  %s604_s16 = scalar_lea.hbm %s872_s2, 64 }
  0x7a   : > { %p601_p7 = scmp.ne.s32.totalorder %s323_s3, %s600_s6  ;;  %p605_p4 = scmp.lt.s32.totalorder %s323_s3, %s872_s2 }
  0x7b   : > { %p606_p10 = scmp.lt.s32.totalorder %s604_s16, %s600_s6 }
  0x7c   : > { %p602_p1 = pnand %p601_p7, %p743_p9 }
  0x7d   : > { %p607_p8 = por %p606_p10, %p605_p4 }
  0x7e   : > { %p603_p2 = pneg %p602_p1 }
  0x80   : > { %p608_p0 = pnand %p607_p8, %p603_p2 }
  0x82   : > { %611 = shalt.err (!%p608_p0)
}
  0x83   : > { %460 = dma.vmem_to_hbm [thread:$0]  (%p743_p9), %s326_s27, 32, %s323_s3, %s311_s7  }
  0x84 PF: > { %s337_s18 = sand.u32 1, %s650_s9   ;;  %p881_p3 = scmp.ge.s32.totalorder %s670_s14, 2 }
  0x85   : > { %s338_s20 = scalar_lea.sflag [#allocation4], %s337_s18 }
  0x86   : > { %p470_p13 = pnand %p881_p3, %p750_p11 }
  0x88   : > { %p471_p5 = pneg %p470_p13 }
  0x8a   : > { %645 = dma.done.wait (%p471_p5), %s338_s20, 32  }
  0x8b   : > { %647 = vsyncadd (%p471_p5), %s338_s20, 4294967264  ;;  %s21_s14 = sadd.s32 1, %s670_s14   ;;  %s882_s9 = smov %s654_s10 }
  0x8c   : > { %p18_p12 = scmp.ge.s32.totalorder %s21_s14, 4   ;;  %s883_s10 = smov %s658_s11 }
  0x8d   : > { %s884_s11 = smov %s748_s23  ;;  %s885_s12 = smov %s666_s13 }
  0x8e   : > { %s886_s13 = smov %s888_s17  ;;  %20 = sbr.rel (!%p18_p12) target bundleno = 8 (0x8), region = 90 }
  0x93   :  { %343 = vsyncpa [#allocation3], 1 }
  0x94   :  { %345 = vsyncpa [#allocation3 + $0x1], 1 }
  0x95   :  { %346 = vsyncpa [#allocation6], 1 }
  0x96   :  { %348 = vsyncpa [#allocation6 + $0x1], 1 }
  0x97   :  { %349 = vsyncpa [#allocation4], 1 }
  0x98   :  { %351 = vsyncpa [#allocation4 + $0x1], 1 }

</bundles_post_ra>
